<compile_context>
chip_gen: v5e
topology: v5e:2x2
jax: 0.10.0
libtpu: 0.0.40
codegen_flags: <defaults>
</compile_context>

<pallas_src>
import jax
import jax.numpy as jnp
from jax import lax
from jax.experimental import pallas as pl
from jax.experimental.pallas import tpu as pltpu

_PI = 3.141592653589793


def _round_up(x, m):
    return (x + m - 1) // m * m


def _onehot_gather_f32(table_ref, idx_col):
    """Gather rows of a VMEM-resident table with a one-hot matmul on the MXU.

    table_ref: (n, w) VMEM ref; idx_col: (tile_b, 1) int32 row ids -> (tile_b, w) f32.
    """
    n = table_ref.shape[0]
    tile_b = idx_col.shape[0]
    iota = lax.broadcasted_iota(jnp.int32, (tile_b, n), 1)
    onehot = (iota == idx_col).astype(jnp.float32)
    return jnp.dot(onehot, table_ref[...].astype(jnp.float32),
                   preferred_element_type=jnp.float32)


# -----------------------------------------------------------------------------
# Path 1: fully VMEM-resident tables, MXU one-hot gather (small tables).
# -----------------------------------------------------------------------------
def _build_onehot_kernel(compute_fn, tile_b):
    def kernel(trip_ref, ent_ref, rel_ref, o_ref):
        idx = trip_ref[...]                                   # (tile_b, 3) int32
        h = _onehot_gather_f32(ent_ref, idx[:, 0:1])
        r = _onehot_gather_f32(rel_ref, idx[:, 1:2])
        t = _onehot_gather_f32(ent_ref, idx[:, 2:3])
        o_ref[...] = compute_fn(h, r, t).reshape(1, tile_b)   # lane-dense store
    return kernel


# -----------------------------------------------------------------------------
# Path 2: entity table in HBM, coalesced full-row DMA gather; relation table
# VMEM-resident and gathered on the MXU while the entity DMAs are in flight.
# -----------------------------------------------------------------------------
def _build_dma_kernel(compute_fn, tile_b, b_pad, ent_width):
    def kernel(trip_smem, trip_ref, rel_ref, ent_hbm, o_ref, hbuf, tbuf, sems):
        base = pl.multiple_of(pl.program_id(0) * tile_b, 8)

        # 1) issue ONE full-row DMA per gathered entity row (head & tail); the
        #    re/im halves ride in the same descriptor (coalesced).
        def issue(row, carry):
            h_idx = trip_smem[base + row]                     # column 0 (heads)
            t_idx = trip_smem[2 * b_pad + base + row]         # column 2 (tails)
            pltpu.make_async_copy(
                ent_hbm.at[pl.ds(h_idx, 1), pl.ds(0, ent_width)],
                hbuf.at[pl.ds(row, 1)],
                sems.at[0],
            ).start()
            pltpu.make_async_copy(
                ent_hbm.at[pl.ds(t_idx, 1), pl.ds(0, ent_width)],
                tbuf.at[pl.ds(row, 1)],
                sems.at[1],
            ).start()
            return carry

        lax.fori_loop(0, tile_b, issue, 0, unroll=8)

        # 2) gather the (tiny, VMEM-resident) relation rows on the MXU while the
        #    entity-row DMAs are still in flight.
        idx = trip_ref[...]
        r = _onehot_gather_f32(rel_ref, idx[:, 1:2])

        # 3) ONE wait per stream: DMA semaphores count bytes, so a descriptor that
        #    spans the whole (tile_b, D) buffer matches tile_b row copies exactly.
        pltpu.make_async_copy(hbuf, hbuf, sems.at[0]).wait()
        pltpu.make_async_copy(tbuf, tbuf, sems.at[1]).wait()

        h = hbuf[...].astype(jnp.float32)
        t = tbuf[...].astype(jnp.float32)
        o_ref[...] = compute_fn(h, r, t).reshape(1, tile_b)   # lane-dense store

    return kernel


# -----------------------------------------------------------------------------
# Wrapper: module "forward" with neg=False semantics.
# -----------------------------------------------------------------------------
def kge_attack_forward(model_name, triplet, relation_embedding, entity_embedding, *,
                       gamma, epsilon, hidden_dim, max_tile_b=512, gather_mode="auto"):
    embedding_range = float((gamma + epsilon) / hidden_dim)
    gamma = float(gamma)

    ent = jnp.asarray(entity_embedding)
    rel = jnp.asarray(relation_embedding)
    triplet = jnp.asarray(triplet).astype(jnp.int32)

    batch = int(triplet.shape[0])
    NE, D = int(ent.shape[0]), int(ent.shape[1])
    NR = int(rel.shape[0])
    d = D // 2

    # ---- per-model relation-like table + scoring math (all shapes static) ----
    if model_name == "TransE":
        rel_like = rel

        def compute(h, r, t):
            return gamma - jnp.sum(jnp.abs(h + r - t), axis=-1)

        flops_row, transc_row = 4 * D, 0

    elif model_name == "DistMult":
        rel_like = rel

        def compute(h, r, t):
            return jnp.sum(h * r * t, axis=-1)

        flops_row, transc_row = 3 * D, 0

    elif model_name == "ComplEx":
        rel_like = rel
        dr = int(rel.shape[1]) // 2

        def compute(h, r, t):
            re_h, im_h = h[:, :d], h[:, d:]
            re_r, im_r = r[:, :dr], r[:, dr:]
            re_t, im_t = t[:, :d], t[:, d:]
            re_s = re_h * re_r - im_h * im_r
            im_s = re_h * im_r + im_h * re_r
            return jnp.sum(re_s * re_t + im_s * im_t, axis=-1)

        flops_row, transc_row = 12 * d, 0

    elif model_name == "RotatE":
        # Per-relation cos/sin precompute (NR x dr each): removes all in-kernel sin/cos
        # and folds the divide into a multiply. Concatenated so one gather covers both.
        dr = int(rel.shape[1])
        phase = rel.astype(jnp.float32) * (_PI / embedding_range)
        rel_like = jnp.concatenate([jnp.cos(phase), jnp.sin(phase)], axis=1)  # (NR, 2*dr)

        def compute(h, r, t):
            re_h, im_h = h[:, :d], h[:, d:]
            cos_r, sin_r = r[:, :dr], r[:, dr:]
            re_t, im_t = t[:, :d], t[:, d:]
            re_s = re_h * cos_r - im_h * sin_r - re_t
            im_s = re_h * sin_r + im_h * cos_r - im_t
            return gamma - jnp.sum(jnp.sqrt(re_s * re_s + im_s * im_s), axis=-1)

        flops_row, transc_row = 14 * d, d

    else:
        raise ValueError(model_name)

    Wr = int(rel_like.shape[1])
    itemsize = int(ent.dtype.itemsize)

    # ---- gather-path selection ----
    ent_bytes = NE * D * itemsize
    rel_bytes = NR * Wr * int(rel_like.dtype.itemsize)
    if gather_mode == "auto":
        gather_mode = "onehot" if (NE <= 4096 and ent_bytes + rel_bytes <= (8 << 20)) else "dma"
    if gather_mode not in ("onehot", "dma"):
        raise ValueError(gather_mode)

    # ---- tiling: lane-dense (1, tile_b) output blocks need tile_b % 128 == 0 unless
    #      the whole (padded) batch is a single tile. Keep gather scratch under budget
    #      (fits comfortably inside the 32 MiB scoped VMEM on v5e/v6e/v7x).
    row_scratch_bytes = 2 * D * itemsize                  # head + tail gather rows
    vmem_budget = 8 << 20
    tile_cap = max(128, (vmem_budget // max(row_scratch_bytes, 1)) // 128 * 128)
    tile_target = max(128, (int(max_tile_b) // 128) * 128)
    tile_target = min(tile_target, tile_cap)

    b_pad128 = _round_up(batch, 128)
    if b_pad128 <= 128:
        tile_b = _round_up(batch, 8)                      # tiny batch: single tile
        b_pad = tile_b
    else:
        tile_b = tile_target
        if b_pad128 <= tile_b:
            # ensure >= 2 tiles so the second TensorCore (v7x megacore) gets work
            tile_b = max(128, _round_up((b_pad128 + 1) // 2, 128))
        b_pad = _round_up(batch, tile_b)
    num_tiles = b_pad // tile_b

    # Pad with index 0 (valid rows; padded scores are sliced off at the end).
    if b_pad != batch:
        trip_pad = jnp.concatenate([triplet, jnp.zeros((b_pad - batch, 3), jnp.int32)], axis=0)
    else:
        trip_pad = triplet

    gather_flops = 2 * NR * Wr
    if gather_mode == "onehot":
        gather_flops += 4 * NE * D
    cost = pl.CostEstimate(
        flops=int((flops_row + gather_flops) * b_pad),
        transcendentals=int(transc_row * b_pad),
        bytes_accessed=int((2 * D + Wr) * itemsize * b_pad + 16 * b_pad),
    )

    out_shape = jax.ShapeDtypeStruct((1, b_pad), jnp.float32)
    compiler_params = pltpu.CompilerParams(
        dimension_semantics=("parallel",),
        vmem_limit_bytes=32 * 1024 * 1024,
    )

    if gather_mode == "onehot":
        kernel = _build_onehot_kernel(compute, tile_b)
        grid_spec = pltpu.PrefetchScalarGridSpec(
            num_scalar_prefetch=0,
            grid=(num_tiles,),
            in_specs=[
                pl.BlockSpec((tile_b, 3), lambda i: (i, 0)),     # per-tile indices (VMEM)
                pl.BlockSpec((NE, D), lambda i: (0, 0)),         # entity table, resident
                pl.BlockSpec((NR, Wr), lambda i: (0, 0)),        # relation-like table, resident
            ],
            out_specs=pl.BlockSpec((1, tile_b), lambda i: (0, i)),
        )
        score = pl.pallas_call(
            kernel, out_shape=out_shape, grid_spec=grid_spec,
            compiler_params=compiler_params, cost_estimate=cost,
        )(trip_pad, ent, rel_like)
    else:
        # Flat, column-major index layout for SMEM: [h_0..h_B, r_0..r_B, t_0..t_B].
        trip_flat = trip_pad.T.reshape(-1).astype(jnp.int32)
        kernel = _build_dma_kernel(compute, tile_b, b_pad, D)
        grid_spec = pltpu.PrefetchScalarGridSpec(
            num_scalar_prefetch=1,
            grid=(num_tiles,),
            in_specs=[
                pl.BlockSpec((tile_b, 3), lambda i, trip: (i, 0)),   # per-tile indices (VMEM)
                pl.BlockSpec((NR, Wr), lambda i, trip: (0, 0)),      # relation table, resident
                pl.BlockSpec(memory_space=pl.ANY),                   # entity table stays in HBM
            ],
            out_specs=pl.BlockSpec((1, tile_b), lambda i, trip: (0, i)),
            scratch_shapes=[
                pltpu.VMEM((tile_b, D), ent.dtype),                  # gathered head rows
                pltpu.VMEM((tile_b, D), ent.dtype),                  # gathered tail rows
                pltpu.SemaphoreType.DMA((2,)),
            ],
        )
        score = pl.pallas_call(
            kernel, out_shape=out_shape, grid_spec=grid_spec,
            compiler_params=compiler_params, cost_estimate=cost,
        )(trip_flat, trip_pad, rel_like, ent)

    return score[0, :batch].reshape(batch, 1)


# -----------------------------------------------------------------------------
# Pure-JAX reference (mirrors the PyTorch math).
# -----------------------------------------------------------------------------
def _reference(model_name, triplet, rel_emb, ent_emb, *, gamma, epsilon, hidden_dim):
    emb_range = (gamma + epsilon) / hidden_dim
    h = ent_emb[triplet[:, 0]][:, None, :]
    r = rel_emb[triplet[:, 1]][:, None, :]
    t = ent_emb[triplet[:, 2]][:, None, :]
    if model_name == "TransE":
        return gamma - jnp.sum(jnp.abs(h + r - t), axis=2)
    if model_name == "DistMult":
        return jnp.sum(h * r * t, axis=2)
    if model_name == "ComplEx":
        rh, ih = jnp.split(h, 2, axis=2)
        rr, ir = jnp.split(r, 2, axis=2)
        rt, it = jnp.split(t, 2, axis=2)
        rs = rh * rr - ih * ir
        is_ = rh * ir + ih * rr
        return jnp.sum(rs * rt + is_ * it, axis=2)
    if model_name == "RotatE":
        rh, ih = jnp.split(h, 2, axis=2)
        rt, it = jnp.split(t, 2, axis=2)
        phase = r / (emb_range / _PI)
        rr, ir = jnp.cos(phase), jnp.sin(phase)
        rs = rh * rr - ih * ir - rt
        is_ = rh * ir + ih * rr - it
        return gamma - jnp.sum(jnp.sqrt(rs * rs + is_ * is_), axis=2)
    raise ValueError(model_name)


if __name__ == "__main__":
    gamma, epsilon, hidden_dim = 12.0, 2.0, 32
    NE, NR = 16, 4

    key = jax.random.PRNGKey(0)
    keys = jax.random.split(key, 6)
    ent_emb = jax.random.normal(keys[0], (NE, hidden_dim), dtype=jnp.float32)
    rel_emb = jax.random.normal(keys[1], (NR, hidden_dim), dtype=jnp.float32)
    rel_emb_rot = jax.random.normal(keys[2], (NR, hidden_dim // 2), dtype=jnp.float32)

    cfg = dict(gamma=gamma, epsilon=epsilon, hidden_dim=hidden_dim)
    failures = []

    def make_trip(k, b):
        kh, kr, kt = jax.random.split(k, 3)
        return jnp.stack([
            jax.random.randint(kh, (b,), 0, NE),
            jax.random.randint(kr, (b,), 0, NR),
            jax.random.randint(kt, (b,), 0, NE),
        ], axis=1).astype(jnp.int32)

    def run_case(tag, name, triplet, mode, max_tile_b=512):
        r_emb = rel_emb_rot if name == "RotatE" else rel_emb
        out = jax.block_until_ready(
            kge_attack_forward(name, triplet, r_emb, ent_emb,
                               gather_mode=mode, max_tile_b=max_tile_b, **cfg))
        ref = _reference(name, triplet, r_emb, ent_emb, **cfg)
        if out.shape != ref.shape or not jnp.allclose(out, ref, atol=1e-3, rtol=1e-3):
            failures.append(tag)
            print("MISMATCH", tag)

    # Single small tile, MXU one-hot gather path (tables fit in VMEM).
    trip8 = make_trip(keys[3], 8)
    for name in ("TransE", "DistMult", "ComplEx", "RotatE"):
        run_case(f"{name}/onehot/B=8", name, trip8, "onehot")

    # Manual-DMA gather path (entity table treated as HBM-resident).
    for name in ("TransE", "RotatE"):
        run_case(f"{name}/dma/B=8", name, trip8, "dma")

    # Multi-tile (3 x 128-lane-dense output blocks) + batch padding, both paths.
    trip300 = make_trip(keys[4], 300)
    run_case("TransE/onehot/B=300", "TransE", trip300, "onehot", max_tile_b=128)
    run_case("RotatE/dma/B=300", "RotatE", trip300, "dma", max_tile_b=128)

    if not failures:
        print("KERNEL_OK")
</pallas_src>

<mosaic_0001>
module attributes {stable_mosaic.version = 11 : i64} {
  func.func @kernel(%arg0: i32, %arg1: memref<8x3xi32, #tpu.memory_space<vmem>>, %arg2: memref<16x32xf32, #tpu.memory_space<vmem>>, %arg3: memref<4x32xf32, #tpu.memory_space<vmem>>, %arg4: memref<1x8xf32, #tpu.memory_space<vmem>>) attributes {dimension_semantics = [#tpu.dimension_semantics<parallel>], iteration_bounds = array<i64: 1>, scalar_prefetch = 0 : i64, scratch_operands = 0 : i64, tpu.core_type = #tpu.core_type<tc>, window_params = [{transform_indices = @transform_0, window_bounds = array<i64: 8, 3>}, {pipeline_mode = #tpu.pipeline_mode<synchronous>, transform_indices = @transform_1, window_bounds = array<i64: 16, 32>}, {pipeline_mode = #tpu.pipeline_mode<synchronous>, transform_indices = @transform_2, window_bounds = array<i64: 4, 32>}, {transform_indices = @transform_3, window_bounds = array<i64: 1, 8>}]} {
    %c0 = arith.constant 0 : index
    %c0_0 = arith.constant 0 : index
    %0 = vector.load %arg1[%c0, %c0_0] : memref<8x3xi32, #tpu.memory_space<vmem>>, vector<8x3xi32>
    %1 = vector.extract_strided_slice %0 {offsets = [0, 0], sizes = [8, 1], strides = [1, 1]} : vector<8x3xi32> to vector<8x1xi32>
    %2 = tpu.iota {dimensions = array<i32: 1>} : vector<8x16xi32>
    %3 = vector.broadcast %1 : vector<8x1xi32> to vector<8x16xi32>
    %4 = arith.cmpi eq, %2, %3 : vector<8x16xi32>
    %5 = arith.extui %4 : vector<8x16xi1> to vector<8x16xi32>
    %6 = arith.sitofp %5 : vector<8x16xi32> to vector<8x16xf32>
    %c0_1 = arith.constant 0 : index
    %c0_2 = arith.constant 0 : index
    %7 = vector.load %arg2[%c0_1, %c0_2] : memref<16x32xf32, #tpu.memory_space<vmem>>, vector<16x32xf32>
    %cst = arith.constant dense<0.000000e+00> : vector<8x32xf32>
    %8 = tpu.matmul %6, %7, %cst {dimension_numbers = #tpu.dot_dimension_numbers<[1], [0], [0], [1], [0, 0, 1, 1], [], []>} : vector<8x16xf32>, vector<16x32xf32>, vector<8x32xf32> -> vector<8x32xf32>
    %9 = vector.extract_strided_slice %0 {offsets = [0, 1], sizes = [8, 1], strides = [1, 1]} : vector<8x3xi32> to vector<8x1xi32>
    %10 = tpu.iota {dimensions = array<i32: 1>} : vector<8x4xi32>
    %11 = vector.broadcast %9 : vector<8x1xi32> to vector<8x4xi32>
    %12 = arith.cmpi eq, %10, %11 : vector<8x4xi32>
    %13 = arith.extui %12 : vector<8x4xi1> to vector<8x4xi32>
    %14 = arith.sitofp %13 : vector<8x4xi32> to vector<8x4xf32>
    %c0_3 = arith.constant 0 : index
    %c0_4 = arith.constant 0 : index
    %15 = vector.load %arg3[%c0_3, %c0_4] : memref<4x32xf32, #tpu.memory_space<vmem>>, vector<4x32xf32>
    %cst_5 = arith.constant dense<0.000000e+00> : vector<8x32xf32>
    %16 = tpu.matmul %14, %15, %cst_5 {dimension_numbers = #tpu.dot_dimension_numbers<[1], [0], [0], [1], [0, 0, 1, 1], [], []>} : vector<8x4xf32>, vector<4x32xf32>, vector<8x32xf32> -> vector<8x32xf32>
    %17 = vector.extract_strided_slice %0 {offsets = [0, 2], sizes = [8, 1], strides = [1, 1]} : vector<8x3xi32> to vector<8x1xi32>
    %18 = tpu.iota {dimensions = array<i32: 1>} : vector<8x16xi32>
    %19 = vector.broadcast %17 : vector<8x1xi32> to vector<8x16xi32>
    %20 = arith.cmpi eq, %18, %19 : vector<8x16xi32>
    %21 = arith.extui %20 : vector<8x16xi1> to vector<8x16xi32>
    %22 = arith.sitofp %21 : vector<8x16xi32> to vector<8x16xf32>
    %c0_6 = arith.constant 0 : index
    %c0_7 = arith.constant 0 : index
    %23 = vector.load %arg2[%c0_6, %c0_7] : memref<16x32xf32, #tpu.memory_space<vmem>>, vector<16x32xf32>
    %cst_8 = arith.constant dense<0.000000e+00> : vector<8x32xf32>
    %24 = tpu.matmul %22, %23, %cst_8 {dimension_numbers = #tpu.dot_dimension_numbers<[1], [0], [0], [1], [0, 0, 1, 1], [], []>} : vector<8x16xf32>, vector<16x32xf32>, vector<8x32xf32> -> vector<8x32xf32>
    %25 = arith.addf %8, %16 : vector<8x32xf32>
    %26 = arith.subf %25, %24 : vector<8x32xf32>
    %27 = math.absf %26 : vector<8x32xf32>
    %cst_9 = arith.constant dense<0.000000e+00> : vector<8xf32>
    %28 = vector.multi_reduction <add>, %27, %cst_9 [1] : vector<8x32xf32> to vector<8xf32>
    %cst_10 = arith.constant 1.200000e+01 : f32
    %29 = vector.broadcast %cst_10 : f32 to vector<8xf32>
    %30 = arith.subf %29, %28 : vector<8xf32>
    %31 = vector.shape_cast %30 : vector<8xf32> to vector<1x8xf32>
    %c0_11 = arith.constant 0 : index
    %c0_12 = arith.constant 0 : index
    %32 = vector.load %arg4[%c0_11, %c0_12] : memref<1x8xf32, #tpu.memory_space<vmem>>, vector<1x8xf32>
    tpu.vector_store %arg4[%c0_11, %c0_12], %31 {strides = array<i32>} : memref<1x8xf32, #tpu.memory_space<vmem>>, vector<1x8xf32>,
    return
  }
  func.func @transform_0(%arg0: i32) -> (i32, i32) {
    %c0_i32 = arith.constant 0 : i32
    %c0_i32_0 = arith.constant 0 : i32
    return %arg0, %c0_i32 : i32, i32
  }
  func.func @transform_1(%arg0: i32) -> (i32, i32) {
    %c0_i32 = arith.constant 0 : i32
    %c0_i32_0 = arith.constant 0 : i32
    %c0_i32_1 = arith.constant 0 : i32
    return %c0_i32, %c0_i32_0 : i32, i32
  }
  func.func @transform_2(%arg0: i32) -> (i32, i32) {
    %c0_i32 = arith.constant 0 : i32
    %c0_i32_0 = arith.constant 0 : i32
    %c0_i32_1 = arith.constant 0 : i32
    return %c0_i32, %c0_i32_0 : i32, i32
  }
  func.func @transform_3(%arg0: i32) -> (i32, i32) {
    %c0_i32 = arith.constant 0 : i32
    %c0_i32_0 = arith.constant 0 : i32
    return %c0_i32, %arg0 : i32, i32
  }
}

</mosaic_0001>

<bundles_post_ra>
// kernel: tpu_custom_call.1
= control target key start
LH: loop header
LB: loop body
LE: loop exit
PB: predicated region body
PF: predicated region fallthrough
CT: control target
= control target key end

     0   :  { %8 = vsyncpa [#allocation3], 0  ;;  %s270_s0 = inlined_call_operand.vmem [shape: s32[8,3], index: 0, kind: input, shape index: {}]   ;;  %s271_s1 = inlined_call_operand.hbm [shape: f32[16,32], index: 1, kind: input, shape index: {}]   ;;  %s272_s2 = inlined_call_operand.vmem [shape: f32[4,32], index: 2, kind: input, shape index: {}]   ;;  %s273_s3 = inlined_call_operand.hbm [shape: f32[1,8], index: 3, kind: output, shape index: {}]  }
   0x1   :  { %9 = vsyncpa [#allocation4], 0  ;;  %s16_s14 = sshll.u32 %s271_s1, 4  ;;  %s230_s15 = smov [#allocation2]   ;;  %s17_s14 = int_to_ptr.hbm [resolvable:$true] %s16_s14 }
   0x2   :  { %s18_s16 = sshll.u32 %s230_s15, 4  ;;  %s231_s17 = smov 128   ;;  %s19_s16 = int_to_ptr.vmem [resolvable:$true] %s18_s16 }
   0x3   :  { %s232_s18 = smov 8  }
   0x4   :  { %24 = dma.hbm_to_vmem [thread:$0]  %s17_s14, 256, %s19_s16, [#allocation3], %s231_s17, %s231_s17, %s232_s18  }
   0x5   :  { %226 = dma.done.wait [#allocation3], 256  }
   0x6   :  { %227 = vsyncadd [#allocation3], 4294967040  ;;  %v233_v0 = vmov 0   ;;  %v234_v1 = vmov 2   ;;  %v31_v2 = vld [vmem:[%s270_s0] sm:$0xff]  ;;  %v41_v3 = vld [vmem:[#allocation2 + $0x8] sm:$0xff]  ;;  %v32_v7 = vlaneseq }
   0x7   :  { %174 = vset.pattern.permute.xlu0 %v233_v0  ;;  %176 = vset.pattern.permute.xlu1 %v234_v1  ;;  %v235_v4 = vmov 1   ;;  %v40_v5 = vld [vmem:[#allocation2] sm:$0xff]  ;;  %vm53_vm0 = vcmask 1043456   ;;  %vm83_vm1 = vcmask 130048   ;;  %v236_v11 = vmov 0.0   ;;  %s237_s0 = smov [#allocation5]  }
   0x8   :  { %35 = vperm.xlu0 %174, %v31_v2   ;;  %78 = vperm.xlu1 %176, %v31_v2   ;;  %v48_v6 = vld [vmem:[%s272_s2] sm:$0xf]  ;;  %v33_v8 = vand.u32 127, %v32_v7  ;;  %vm49_vm4 = vcmask 31744   ;;  %vm132_vm6 = vcmask 261120   ;;  %s147_s2 = sshll.u32 %s237_s0, 4  ;;  %s148_s2 = int_to_ptr.vmem [resolvable:$true] %s147_s2 }
   0x9   :  { %124 = vmatpush.msra.mxu2 %v41_v3  ;;  %101 = vmatpush.msra.mxu1 %v41_v3  ;;  %s149_s24 = sshll.u32 %s273_s3, 4  ;;  %vm140_vm7 = vcmask 57344   ;;  %s150_s24 = int_to_ptr.hbm [resolvable:$true] %s149_s24 }
   0xa   :  { %161 = vmatpush.msk.msra.mxu0 %vm53_vm0, %v48_v6 }
   0xb   :  { %125 = vmatpush.msra.mxu2 %v40_v5  ;;  %102 = vmatpush.msra.mxu1 %v40_v5 }
  0x10   :  { %175 = vset.pattern.permute.xlu0 %v235_v4 }
  0x11   :  { %43 = vperm.xlu0 %175, %v31_v2  }
  0x19   :  { %177 = vset.pattern.permute.xlu0 %v234_v1 }
  0x7a   :  { %v36_v9 = vpop.permute.xlu0 %35  ;;  %v79_v10 = vpop.permute.xlu1 %78 }
  0x7b   :  { %vm37_vm2 = vcmp.eq.s32.totalorder %v33_v8, %v36_v9  ;;  %vm80_vm3 = vcmp.eq.s32.totalorder %v33_v8, %v79_v10 }
  0x7c   :  { %v159_v12 = vsel %vm37_vm2, 1.0, %v236_v11  ;;  %v163_v13 = vsel %vm80_vm3, 1.0, %v236_v11 }
  0x7d   :  { %165 = vmatmul.msk.f32.vlgmr.msra.gmra.mxu2 %vm83_vm1, %v159_v12  ;;  %164 = vmatmul.msk.f32.vlgmr.msra.gmra.mxu1 %vm83_vm1, %v163_v13 }
  0x83   :  { %v44_v14 = vpop.permute.xlu0 %43 }
  0x84   :  { %vm45_vm5 = vcmp.eq.s32.totalorder %v33_v8, %v44_v14 }
  0x85   :  { %v160_v15 = vsel %vm45_vm5, 1.0, %v236_v11 }
  0x86   :  { %162 = vmatmul.msk.f32.vlgmr.msra.gmra.mxu0 %vm49_vm4, %v160_v15 }
  0xfa   :  { %v104_v16 = vpop.f32.mrf.mxu1 }
 0x100   :  { %v127_v17 = vpop.f32.mrf.mxu2 }
 0x103   :  { %v74_v18 = vpop.f32.mrf.mxu0 }
 0x104   :  { %v128_v19 = vadd.f32 %v127_v17, %v74_v18 }
 0x106   :  { %v130_v20 = vsub.f32 %v128_v19, %v104_v16 }
 0x108   :  { %v131_v21 = vand.u32 2147483647, %v130_v20 }
 0x10a   :  { %v133_v22 = vsel %vm132_vm6, %v131_v21, 0.0 }
 0x10b   :  { %134 = vadd.xlane.f32.xlu1 %v133_v22 }
 0x17e   :  { %v135_v23 = vpop.xlane.xlu1 %134 }
 0x17f   :  { %v136_v24 = vsub.f32 12.0, %v135_v23 }
 0x181   :  { %v138_v25 = vperm.slane %v136_v24, %v33_v8 }
 0x183   :  { %141 = vst.msk [vmem:[#allocation5] sm:$0x1] %vm140_vm7, %v138_v25 }
 0x184   :  { %152 = dma.vmem_to_hbm [thread:$0]  %s148_s2, 16, %s150_s24, [#allocation4]  }
 0x185   :  { %228 = dma.done.wait [#allocation4], 16  }
 0x186   :  { %229 = vsyncadd [#allocation4], 4294967280 }
 0x187   :  { %157 = vsyncpa [#allocation3], 1 }
 0x188   :  { %158 = vsyncpa [#allocation4], 1 }

</bundles_post_ra>
